<compile_context>
chip_gen: v7x
topology: tpu7x:2x2x1
jax: 0.10.0
libtpu: 0.0.40
codegen_flags: <defaults>
</compile_context>

<pallas_src>
import functools
import math

import jax
import jax.numpy as jnp
from jax.experimental import pallas as pl
from jax.experimental.pallas import tpu as pltpu


def _gelu_exact(x):
    # PyTorch nn.GELU() default = exact erf-based GELU (strict-numerics mode).
    return 0.5 * x * (1.0 + jax.lax.erf(x / math.sqrt(2.0)))


def _gelu_tanh(x):
    # tanh approximation -> EUP slot; slight numerics deviation vs nn.GELU().
    return jax.nn.gelu(x, approximate=True)


def _gff_kernel(x_ref, w1_ref, b1_ref, w2_ref, b2_ref, o_ref, *,
                n_chunks, chunk, gelu, mxu_dtype):
    x = x_ref[...].astype(mxu_dtype)                              # (TM, D)
    acc = jnp.zeros((x_ref.shape[0], o_ref.shape[-1]), jnp.float32)
    # Static unroll over 128-lane hidden slabs: live intermediate stays
    # (TM, 128); second-layer contributions accumulate in f32.
    for c in range(n_chunks):
        lo = c * chunk
        h = jnp.dot(x, w1_ref[:, lo:lo + chunk].astype(mxu_dtype),
                    preferred_element_type=jnp.float32)
        h = gelu(h + b1_ref[:, lo:lo + chunk])
        acc = acc + jnp.dot(h.astype(mxu_dtype),
                            w2_ref[lo:lo + chunk, :].astype(mxu_dtype),
                            preferred_element_type=jnp.float32)
    y = gelu(acc + b2_ref[...])
    o_ref[...] = y.astype(o_ref.dtype)


def fuse_params(w1, b1, w2, b2, *, bf16_matmul=True):
    """Build the block-diagonal fused parameters ONCE (hoist out of hot path).

    w1: (groups, dim, dim*mult)   b1: (groups, 1, dim*mult)
    w2: (groups, dim*mult, dim)   b2: (groups, 1, dim)
    (per-group weights stored transposed for right-multiplication)
    """
    groups, dim, hid = w1.shape
    wd = jnp.bfloat16 if bf16_matmul else w1.dtype
    w1_bd = jax.scipy.linalg.block_diag(*w1).astype(wd)           # (g*dim, g*hid)
    w2_bd = jax.scipy.linalg.block_diag(*w2).astype(wd)           # (g*hid, g*dim)
    b1_bd = b1.reshape(1, groups * hid).astype(jnp.float32)
    b2_bd = b2.reshape(1, groups * dim).astype(jnp.float32)
    return w1_bd, b1_bd, w2_bd, b2_bd


def _pick_row_tile(M, tm, ra):
    """Pick the row-tile size.

    Preference order: (1) no host-side padding copy, (2) >= 2 grid steps so
    v7x's two TensorCores both get work, (3) largest tile <= tm.
    `ra` = sublane row alignment for the I/O dtype (8 f32 / 16 bf16 / 32 int8).
    """
    tm = max(ra, (tm // ra) * ra)
    if M <= tm:
        # Whole M fits in one tile: split it in two (aligned) when possible so
        # grid_m >= 2; otherwise take the full extent (always legal).
        if M % ra == 0 and (M // 2) >= ra and (M // 2) % ra == 0:
            return M // 2, False
        return M, False
    # M > tm: look for an aligned divisor of M close to tm (no host pad).
    if M % ra == 0:
        c = tm
        while c >= max(ra, tm // 4):
            if M % c == 0:
                return c, False
            c -= ra
    # Fall back: pad M up to a multiple of tm (extra HBM copy, last resort).
    return tm, True


def grouped_feed_forward(levels, w1_bd, b1_bd, w2_bd, b2_bd, *,
                         tm=2048, use_tanh_gelu=True):
    """levels: (b, n, groups, dim) -> same shape.  Fused params from fuse_params()."""
    b, n, groups, dim = levels.shape
    M = b * n
    D = groups * dim                     # fused (lane-dense) in/out width
    H = w1_bd.shape[-1]                  # fused hidden width
    assert w1_bd.shape == (D, H) and w2_bd.shape == (H, D)

    x = levels.reshape(M, D)             # contiguous reshape -> free view

    itemsize = jnp.dtype(levels.dtype).itemsize
    ra = {4: 8, 2: 16, 1: 32}.get(itemsize, 8)
    tm_eff, needs_pad = _pick_row_tile(M, tm, ra)
    if needs_pad:
        m_pad = pl.cdiv(M, tm_eff) * tm_eff
        x = jnp.pad(x, ((0, m_pad - M), (0, 0)))
    else:
        m_pad = M
    grid_m = m_pad // tm_eff

    gelu = _gelu_tanh if use_tanh_gelu else _gelu_exact
    mxu_dtype = jnp.bfloat16 if w1_bd.dtype == jnp.bfloat16 else jnp.float32
    if H % 128 == 0 and H > 128:
        n_chunks, chunk = H // 128, 128
    else:
        n_chunks, chunk = 1, H

    kernel = functools.partial(_gff_kernel, n_chunks=n_chunks, chunk=chunk,
                               gelu=gelu, mxu_dtype=mxu_dtype)

    out = pl.pallas_call(
        kernel,
        out_shape=jax.ShapeDtypeStruct((m_pad, D), levels.dtype),
        grid_spec=pltpu.PrefetchScalarGridSpec(
            num_scalar_prefetch=0,
            grid=(grid_m,),
            in_specs=[
                pl.BlockSpec((tm_eff, D), lambda m: (m, 0)),   # x tiles (pipelined)
                pl.BlockSpec((D, H), lambda m: (0, 0)),        # W1 resident in VMEM
                pl.BlockSpec((1, H), lambda m: (0, 0)),        # b1 resident
                pl.BlockSpec((H, D), lambda m: (0, 0)),        # W2 resident
                pl.BlockSpec((1, D), lambda m: (0, 0)),        # b2 resident
            ],
            out_specs=pl.BlockSpec((tm_eff, D), lambda m: (m, 0)),
        ),
        compiler_params=pltpu.CompilerParams(
            dimension_semantics=("parallel",)),
    )(x, w1_bd, b1_bd, w2_bd, b2_bd)

    return out[:M].reshape(b, n, groups, dim)


def _reference(levels, w1, b1, w2, b2):
    # Pure-JAX reference of the grouped 1x1 conv feed-forward (erf GELU, f32).
    h = jnp.einsum("bngd,gdh->bngh", levels, w1) + b1[:, 0][None, None]
    h = _gelu_exact(h)
    y = jnp.einsum("bngh,ghd->bngd", h, w2) + b2[:, 0][None, None]
    return _gelu_exact(y)


if __name__ == "__main__":
    # Module hyperparameters (small, consistent with the forward pass).
    dim, groups, mult = 32, 4, 4
    b, n = 2, 8
    hidden = dim * mult

    key = jax.random.PRNGKey(0)
    k_x, k_w1, k_b1, k_w2, k_b2 = jax.random.split(key, 5)

    levels = jax.random.normal(k_x, (b, n, groups, dim), dtype=jnp.float32)

    # Deterministic parameter init (Conv1d(groups=g) weight split per group,
    # stored transposed for right-multiplication: (g, in, out)).
    w1 = jax.random.normal(k_w1, (groups, dim, hidden), jnp.float32) * (1.0 / math.sqrt(dim))
    b1 = jax.random.normal(k_b1, (groups, 1, hidden), jnp.float32) * 0.02
    w2 = jax.random.normal(k_w2, (groups, hidden, dim), jnp.float32) * (1.0 / math.sqrt(hidden))
    b2 = jax.random.normal(k_b2, (groups, 1, dim), jnp.float32) * 0.02

    ref = _reference(levels, w1, b1, w2, b2)

    # Strict-numerics mode: erf GELU + f32 MXU -> matches the PyTorch module.
    fused_strict = fuse_params(w1, b1, w2, b2, bf16_matmul=False)
    out_strict = jax.block_until_ready(
        grouped_feed_forward(levels, *fused_strict, use_tanh_gelu=False))
    assert out_strict.shape == (b, n, groups, dim)
    assert jnp.allclose(out_strict, ref, atol=1e-5, rtol=1e-5)

    # Fast mode (default): tanh GELU on the EUP + bf16 MXU operands.
    fused_fast = fuse_params(w1, b1, w2, b2, bf16_matmul=True)
    out_fast = jax.block_until_ready(grouped_feed_forward(levels, *fused_fast))
    assert out_fast.shape == (b, n, groups, dim)
    assert jnp.allclose(out_fast, ref, atol=5e-2, rtol=5e-2)

    print("KERNEL_OK")
</pallas_src>

<mosaic_0001>
module attributes {stable_mosaic.version = 11 : i64} {
  func.func @_gff_kernel(%arg0: i32, %arg1: memref<8x128xf32, #tpu.memory_space<vmem>>, %arg2: memref<128x512xf32, #tpu.memory_space<vmem>>, %arg3: memref<1x512xf32, #tpu.memory_space<vmem>>, %arg4: memref<512x128xf32, #tpu.memory_space<vmem>>, %arg5: memref<1x128xf32, #tpu.memory_space<vmem>>, %arg6: memref<8x128xf32, #tpu.memory_space<vmem>>) attributes {dimension_semantics = [#tpu.dimension_semantics<parallel>], iteration_bounds = array<i64: 2>, scalar_prefetch = 0 : i64, scratch_operands = 0 : i64, tpu.core_type = #tpu.core_type<tc>, window_params = [{transform_indices = @transform_0, window_bounds = array<i64: 8, 128>}, {pipeline_mode = #tpu.pipeline_mode<synchronous>, transform_indices = @transform_1, window_bounds = array<i64: 128, 512>}, {pipeline_mode = #tpu.pipeline_mode<synchronous>, transform_indices = @transform_2, window_bounds = array<i64: 1, 512>}, {pipeline_mode = #tpu.pipeline_mode<synchronous>, transform_indices = @transform_3, window_bounds = array<i64: 512, 128>}, {pipeline_mode = #tpu.pipeline_mode<synchronous>, transform_indices = @transform_4, window_bounds = array<i64: 1, 128>}, {transform_indices = @transform_5, window_bounds = array<i64: 8, 128>}]} {
    %c0 = arith.constant 0 : index
    %c0_0 = arith.constant 0 : index
    %0 = vector.load %arg1[%c0, %c0_0] : memref<8x128xf32, #tpu.memory_space<vmem>>, vector<8x128xf32>
    %cst = arith.constant 0.000000e+00 : f32
    %1 = vector.broadcast %cst : f32 to vector<8x128xf32>
    %c0_1 = arith.constant 0 : index
    %c0_2 = arith.constant 0 : index
    %2 = vector.load %arg2[%c0_1, %c0_2] : memref<128x512xf32, #tpu.memory_space<vmem>>, vector<128x128xf32>
    %cst_3 = arith.constant dense<0.000000e+00> : vector<8x128xf32>
    %3 = tpu.matmul %0, %2, %cst_3 {dimension_numbers = #tpu.dot_dimension_numbers<[1], [0], [0], [1], [0, 0, 1, 1], [], []>} : vector<8x128xf32>, vector<128x128xf32>, vector<8x128xf32> -> vector<8x128xf32>
    %c0_4 = arith.constant 0 : index
    %c0_5 = arith.constant 0 : index
    %4 = vector.load %arg3[%c0_4, %c0_5] : memref<1x512xf32, #tpu.memory_space<vmem>>, vector<1x128xf32>
    %5 = vector.broadcast %4 : vector<1x128xf32> to vector<8x128xf32>
    %6 = arith.addf %3, %5 : vector<8x128xf32>
    %cst_6 = arith.constant 5.000000e-01 : f32
    %7 = vector.broadcast %cst_6 : f32 to vector<8x128xf32>
    %8 = arith.mulf %7, %6 : vector<8x128xf32>
    %cst_7 = arith.constant 1.41421354 : f32
    %9 = vector.broadcast %cst_7 : f32 to vector<8x128xf32>
    %10 = arith.divf %6, %9 : vector<8x128xf32>
    %11 = math.erf %10 : vector<8x128xf32>
    %cst_8 = arith.constant 1.000000e+00 : f32
    %12 = vector.broadcast %cst_8 : f32 to vector<8x128xf32>
    %13 = arith.addf %12, %11 : vector<8x128xf32>
    %14 = arith.mulf %8, %13 : vector<8x128xf32>
    %c0_9 = arith.constant 0 : index
    %c0_10 = arith.constant 0 : index
    %15 = vector.load %arg4[%c0_9, %c0_10] : memref<512x128xf32, #tpu.memory_space<vmem>>, vector<128x128xf32>
    %cst_11 = arith.constant dense<0.000000e+00> : vector<8x128xf32>
    %16 = tpu.matmul %14, %15, %cst_11 {dimension_numbers = #tpu.dot_dimension_numbers<[1], [0], [0], [1], [0, 0, 1, 1], [], []>} : vector<8x128xf32>, vector<128x128xf32>, vector<8x128xf32> -> vector<8x128xf32>
    %17 = arith.addf %1, %16 : vector<8x128xf32>
    %c0_12 = arith.constant 0 : index
    %c128 = arith.constant 128 : index
    %18 = vector.load %arg2[%c0_12, %c128] : memref<128x512xf32, #tpu.memory_space<vmem>>, vector<128x128xf32>
    %cst_13 = arith.constant dense<0.000000e+00> : vector<8x128xf32>
    %19 = tpu.matmul %0, %18, %cst_13 {dimension_numbers = #tpu.dot_dimension_numbers<[1], [0], [0], [1], [0, 0, 1, 1], [], []>} : vector<8x128xf32>, vector<128x128xf32>, vector<8x128xf32> -> vector<8x128xf32>
    %c0_14 = arith.constant 0 : index
    %c128_15 = arith.constant 128 : index
    %20 = vector.load %arg3[%c0_14, %c128_15] : memref<1x512xf32, #tpu.memory_space<vmem>>, vector<1x128xf32>
    %21 = vector.broadcast %20 : vector<1x128xf32> to vector<8x128xf32>
    %22 = arith.addf %19, %21 : vector<8x128xf32>
    %cst_16 = arith.constant 5.000000e-01 : f32
    %23 = vector.broadcast %cst_16 : f32 to vector<8x128xf32>
    %24 = arith.mulf %23, %22 : vector<8x128xf32>
    %cst_17 = arith.constant 1.41421354 : f32
    %25 = vector.broadcast %cst_17 : f32 to vector<8x128xf32>
    %26 = arith.divf %22, %25 : vector<8x128xf32>
    %27 = math.erf %26 : vector<8x128xf32>
    %cst_18 = arith.constant 1.000000e+00 : f32
    %28 = vector.broadcast %cst_18 : f32 to vector<8x128xf32>
    %29 = arith.addf %28, %27 : vector<8x128xf32>
    %30 = arith.mulf %24, %29 : vector<8x128xf32>
    %c128_19 = arith.constant 128 : index
    %c0_20 = arith.constant 0 : index
    %31 = vector.load %arg4[%c128_19, %c0_20] : memref<512x128xf32, #tpu.memory_space<vmem>>, vector<128x128xf32>
    %cst_21 = arith.constant dense<0.000000e+00> : vector<8x128xf32>
    %32 = tpu.matmul %30, %31, %cst_21 {dimension_numbers = #tpu.dot_dimension_numbers<[1], [0], [0], [1], [0, 0, 1, 1], [], []>} : vector<8x128xf32>, vector<128x128xf32>, vector<8x128xf32> -> vector<8x128xf32>
    %33 = arith.addf %17, %32 : vector<8x128xf32>
    %c0_22 = arith.constant 0 : index
    %c256 = arith.constant 256 : index
    %34 = vector.load %arg2[%c0_22, %c256] : memref<128x512xf32, #tpu.memory_space<vmem>>, vector<128x128xf32>
    %cst_23 = arith.constant dense<0.000000e+00> : vector<8x128xf32>
    %35 = tpu.matmul %0, %34, %cst_23 {dimension_numbers = #tpu.dot_dimension_numbers<[1], [0], [0], [1], [0, 0, 1, 1], [], []>} : vector<8x128xf32>, vector<128x128xf32>, vector<8x128xf32> -> vector<8x128xf32>
    %c0_24 = arith.constant 0 : index
    %c256_25 = arith.constant 256 : index
    %36 = vector.load %arg3[%c0_24, %c256_25] : memref<1x512xf32, #tpu.memory_space<vmem>>, vector<1x128xf32>
    %37 = vector.broadcast %36 : vector<1x128xf32> to vector<8x128xf32>
    %38 = arith.addf %35, %37 : vector<8x128xf32>
    %cst_26 = arith.constant 5.000000e-01 : f32
    %39 = vector.broadcast %cst_26 : f32 to vector<8x128xf32>
    %40 = arith.mulf %39, %38 : vector<8x128xf32>
    %cst_27 = arith.constant 1.41421354 : f32
    %41 = vector.broadcast %cst_27 : f32 to vector<8x128xf32>
    %42 = arith.divf %38, %41 : vector<8x128xf32>
    %43 = math.erf %42 : vector<8x128xf32>
    %cst_28 = arith.constant 1.000000e+00 : f32
    %44 = vector.broadcast %cst_28 : f32 to vector<8x128xf32>
    %45 = arith.addf %44, %43 : vector<8x128xf32>
    %46 = arith.mulf %40, %45 : vector<8x128xf32>
    %c256_29 = arith.constant 256 : index
    %c0_30 = arith.constant 0 : index
    %47 = vector.load %arg4[%c256_29, %c0_30] : memref<512x128xf32, #tpu.memory_space<vmem>>, vector<128x128xf32>
    %cst_31 = arith.constant dense<0.000000e+00> : vector<8x128xf32>
    %48 = tpu.matmul %46, %47, %cst_31 {dimension_numbers = #tpu.dot_dimension_numbers<[1], [0], [0], [1], [0, 0, 1, 1], [], []>} : vector<8x128xf32>, vector<128x128xf32>, vector<8x128xf32> -> vector<8x128xf32>
    %49 = arith.addf %33, %48 : vector<8x128xf32>
    %c0_32 = arith.constant 0 : index
    %c384 = arith.constant 384 : index
    %50 = vector.load %arg2[%c0_32, %c384] : memref<128x512xf32, #tpu.memory_space<vmem>>, vector<128x128xf32>
    %cst_33 = arith.constant dense<0.000000e+00> : vector<8x128xf32>
    %51 = tpu.matmul %0, %50, %cst_33 {dimension_numbers = #tpu.dot_dimension_numbers<[1], [0], [0], [1], [0, 0, 1, 1], [], []>} : vector<8x128xf32>, vector<128x128xf32>, vector<8x128xf32> -> vector<8x128xf32>
    %c0_34 = arith.constant 0 : index
    %c384_35 = arith.constant 384 : index
    %52 = vector.load %arg3[%c0_34, %c384_35] : memref<1x512xf32, #tpu.memory_space<vmem>>, vector<1x128xf32>
    %53 = vector.broadcast %52 : vector<1x128xf32> to vector<8x128xf32>
    %54 = arith.addf %51, %53 : vector<8x128xf32>
    %cst_36 = arith.constant 5.000000e-01 : f32
    %55 = vector.broadcast %cst_36 : f32 to vector<8x128xf32>
    %56 = arith.mulf %55, %54 : vector<8x128xf32>
    %cst_37 = arith.constant 1.41421354 : f32
    %57 = vector.broadcast %cst_37 : f32 to vector<8x128xf32>
    %58 = arith.divf %54, %57 : vector<8x128xf32>
    %59 = math.erf %58 : vector<8x128xf32>
    %cst_38 = arith.constant 1.000000e+00 : f32
    %60 = vector.broadcast %cst_38 : f32 to vector<8x128xf32>
    %61 = arith.addf %60, %59 : vector<8x128xf32>
    %62 = arith.mulf %56, %61 : vector<8x128xf32>
    %c384_39 = arith.constant 384 : index
    %c0_40 = arith.constant 0 : index
    %63 = vector.load %arg4[%c384_39, %c0_40] : memref<512x128xf32, #tpu.memory_space<vmem>>, vector<128x128xf32>
    %cst_41 = arith.constant dense<0.000000e+00> : vector<8x128xf32>
    %64 = tpu.matmul %62, %63, %cst_41 {dimension_numbers = #tpu.dot_dimension_numbers<[1], [0], [0], [1], [0, 0, 1, 1], [], []>} : vector<8x128xf32>, vector<128x128xf32>, vector<8x128xf32> -> vector<8x128xf32>
    %65 = arith.addf %49, %64 : vector<8x128xf32>
    %c0_42 = arith.constant 0 : index
    %c0_43 = arith.constant 0 : index
    %66 = vector.load %arg5[%c0_42, %c0_43] : memref<1x128xf32, #tpu.memory_space<vmem>>, vector<1x128xf32>
    %67 = vector.broadcast %66 : vector<1x128xf32> to vector<8x128xf32>
    %68 = arith.addf %65, %67 : vector<8x128xf32>
    %cst_44 = arith.constant 5.000000e-01 : f32
    %69 = vector.broadcast %cst_44 : f32 to vector<8x128xf32>
    %70 = arith.mulf %69, %68 : vector<8x128xf32>
    %cst_45 = arith.constant 1.41421354 : f32
    %71 = vector.broadcast %cst_45 : f32 to vector<8x128xf32>
    %72 = arith.divf %68, %71 : vector<8x128xf32>
    %73 = math.erf %72 : vector<8x128xf32>
    %cst_46 = arith.constant 1.000000e+00 : f32
    %74 = vector.broadcast %cst_46 : f32 to vector<8x128xf32>
    %75 = arith.addf %74, %73 : vector<8x128xf32>
    %76 = arith.mulf %70, %75 : vector<8x128xf32>
    %c0_47 = arith.constant 0 : index
    %c0_48 = arith.constant 0 : index
    %77 = vector.load %arg6[%c0_47, %c0_48] : memref<8x128xf32, #tpu.memory_space<vmem>>, vector<8x128xf32>
    tpu.vector_store %arg6[%c0_47, %c0_48], %76 {strides = array<i32>} : memref<8x128xf32, #tpu.memory_space<vmem>>, vector<8x128xf32>,
    return
  }
  func.func @transform_0(%arg0: i32) -> (i32, i32) {
    %c0_i32 = arith.constant 0 : i32
    %c0_i32_0 = arith.constant 0 : i32
    return %arg0, %c0_i32 : i32, i32
  }
  func.func @transform_1(%arg0: i32) -> (i32, i32) {
    %c0_i32 = arith.constant 0 : i32
    %c0_i32_0 = arith.constant 0 : i32
    %c0_i32_1 = arith.constant 0 : i32
    return %c0_i32, %c0_i32_0 : i32, i32
  }
  func.func @transform_2(%arg0: i32) -> (i32, i32) {
    %c0_i32 = arith.constant 0 : i32
    %c0_i32_0 = arith.constant 0 : i32
    %c0_i32_1 = arith.constant 0 : i32
    return %c0_i32, %c0_i32_0 : i32, i32
  }
  func.func @transform_3(%arg0: i32) -> (i32, i32) {
    %c0_i32 = arith.constant 0 : i32
    %c0_i32_0 = arith.constant 0 : i32
    %c0_i32_1 = arith.constant 0 : i32
    return %c0_i32, %c0_i32_0 : i32, i32
  }
  func.func @transform_4(%arg0: i32) -> (i32, i32) {
    %c0_i32 = arith.constant 0 : i32
    %c0_i32_0 = arith.constant 0 : i32
    %c0_i32_1 = arith.constant 0 : i32
    return %c0_i32, %c0_i32_0 : i32, i32
  }
  func.func @transform_5(%arg0: i32) -> (i32, i32) {
    %c0_i32 = arith.constant 0 : i32
    %c0_i32_0 = arith.constant 0 : i32
    return %arg0, %c0_i32 : i32, i32
  }
}

</mosaic_0001>

<bundles_post_ra>
// kernel: tpu_custom_call.1
= control target key start
LH: loop header
LB: loop body
LE: loop exit
PB: predicated region body
PF: predicated region fallthrough
CT: control target
= control target key end

     0   :  { %10 = vsyncpa [#allocation3], 0  ;;  %s2378_s0 = inlined_call_operand.hbm [shape: f32[16,128], index: 0, kind: input, shape index: {}]   ;;  %s2379_s1 = inlined_call_operand.hbm [shape: f32[128,512], index: 1, kind: input, shape index: {}]   ;;  %s2380_s2 = inlined_call_operand.vmem [shape: f32[1,512], index: 2, kind: input, shape index: {}]   ;;  %s2381_s3 = inlined_call_operand.hbm [shape: f32[512,128], index: 3, kind: input, shape index: {}]   ;;  %s2382_s4 = inlined_call_operand.vmem [shape: f32[1,128], index: 4, kind: input, shape index: {}]   ;;  %s2383_s5 = inlined_call_operand.hbm [shape: f32[16,128], index: 5, kind: output, shape index: {}]  }
   0x1   :  { %12 = vsyncpa [#allocation3 + $0x1], 0 }
   0x2   :  { %13 = vsyncpa [#allocation6], 0 }
   0x3   :  { %14 = vsyncpa [#allocation4], 0 }
   0x4   :  { %16 = vsyncpa [#allocation4 + $0x1], 0  ;;  %s2038_s18 = smov 0   ;;  %s2040_s19 = smov 0  }
   0x5   :  { %s2042_s20 = smov 0   ;;  %s2044_s21 = smov 0  }
   0x6 LB: > { %s2059_s22 = sadd.s32 4294967295, %s1995_s21   ;;  %s1126_s23 = sadd.s32 4294967294, %s1995_s21   ;;  %s1995_s21 = sphi %s2044_s21, %s2403_s21   ;;  %s1991_s20 = sphi %s2042_s20, %s2402_s20   ;;  %s1987_s19 = sphi %s2040_s19, %s2401_s19   ;;  %s1983_s18 = sphi %s2038_s18, %s2400_s18  }
   0x7   : > { %p42_p0 = scmp.ne.s32.totalorder %s1987_s19, %s1983_s18  ;;  %p2384_p1 = scmp.eq.s32.totalorder %s2059_s22, 0 }
   0x8   : > { %p156_p3 = scmp.eq.s32.totalorder %s1126_s23, 1  ;;  %p1127_p5 = scmp.ge.s32.totalorder %s1995_s21, 1 }
   0x9   : > { %p2068_p4 = por %p2384_p1, %p42_p0  ;;  %p163_p7 = scmp.lt.s32.totalorder %s1995_s21, 3 }
   0xa   : > { %p2073_p6 = por %p156_p3, %p42_p0  ;;  %s1997_s27 = smov [#allocation5]  }
   0xb   : > { %s2387_s24 = scalar_select %p2068_p4, 1, 0 }
   0xc   : > { %s2388_s25 = scalar_select %p2073_p6, 1, 0 }
   0xd   : > { %p2078_p8 = pnand %p1127_p5, %p163_p7  ;;  %s175_s28 = sshll.u32 %s1997_s27, 4  ;;  %s2082_s28 = int_to_ptr.vmem [resolvable:$true] %s175_s28 }
   0xe   : > { %s1998_s30 = smov [#allocation7]   ;;  %s1839_s9 = scalar_lea.hbm %s2379_s1, 8192 }
   0xf   : > { %p1767_p9 = pneg %p2078_p8  ;;  %s191_s6 = sshll.u32 %s1998_s30, 4  ;;  %s2093_s6 = int_to_ptr.vmem [resolvable:$true] %s191_s6 }
  0x10   : > { %p1840_p12 = scmp.ne.s32.totalorder %s2379_s1, %s1839_s9  ;;  %p1846_p5 = scmp.lt.u32.totalorder %s1839_s9, %s2379_s1 }
  0x11   : > { %p2089_p11 = pnand %p1767_p9, %p2384_p1 }
  0x13   : > { %p1841_p13 = pneg %p2089_p11 }
  0x15   : > { %p1842_p0 = pnand %p1841_p13, %p1840_p12 }
  0x17   : > { %p1843_p3 = pneg %p1842_p0 }
  0x19   : > { %p1848_p7 = pnand %p1846_p5, %p1843_p3 }
  0x1b   : > { %1851 = shalt.err (!%p1848_p7)
}
  0x1c   : > { %s1852_s14 = scalar_lea.vmem %s2082_s28, 8192  ;;  %p1860_p2 = scmp.lt.s32.totalorder %s2082_s28, %s2082_s28 }
  0x1d   : > { %p1853_p9 = scmp.ne.s32.totalorder %s2082_s28, %s1852_s14  ;;  %p1861_p12 = scmp.lt.s32.totalorder %s1852_s14, %s1852_s14 }
  0x1f   : > { %p1855_p10 = pnand %p1853_p9, %p1841_p13  ;;  %p1862_p0 = por %p1861_p12, %p1860_p2 }
  0x21   : > { %p1856_p1 = pneg %p1855_p10 }
  0x23   : > { %p1863_p6 = pnand %p1862_p0, %p1856_p1 }
  0x25   : > { %1866 = shalt.err (!%p1863_p6)
}
  0x26   : > { %s1999_s15 = smov 512   ;;  %s2000_s16 = smov 32  }
  0x27   : > { %1770 = dma.hbm_to_vmem [thread:$0]  (!%p2089_p11), %s2379_s1, 8192, %s2082_s28, [#allocation6], %s1999_s15, %s1999_s15, %s2000_s16  }
  0x28   : > { %s1867_s7 = scalar_lea.hbm %s2381_s3, 8192 }
  0x29   : > { %p1868_p2 = scmp.ne.s32.totalorder %s2381_s3, %s1867_s7  ;;  %p1874_p10 = scmp.lt.u32.totalorder %s1867_s7, %s2381_s3 }
  0x2b   : > { %p1870_p1 = pnand %p1868_p2, %p1841_p13 }
  0x2d   : > { %p1871_p6 = pneg %p1870_p1 }
  0x2f   : > { %p1876_p3 = pnand %p1874_p10, %p1871_p6 }
  0x31   : > { %1879 = shalt.err (!%p1876_p3)
}
  0x32   : > { %s1880_s28 = scalar_lea.vmem %s2093_s6, 8192  ;;  %p1888_p12 = scmp.lt.s32.totalorder %s2093_s6, %s2093_s6 }
  0x33   : > { %p1881_p5 = scmp.ne.s32.totalorder %s2093_s6, %s1880_s28  ;;  %p1889_p0 = scmp.lt.s32.totalorder %s1880_s28, %s1880_s28 }
  0x35   : > { %p1883_p7 = pnand %p1881_p5, %p1841_p13  ;;  %p1890_p2 = por %p1889_p0, %p1888_p12 }
  0x37   : > { %p1884_p9 = pneg %p1883_p7 }
  0x39   : > { %p1891_p1 = pnand %p1890_p2, %p1884_p9 }
  0x3b   : > { %1894 = shalt.err (!%p1891_p1)
}
  0x3c   : > { %s2001_s12 = smov 128   ;;  %s2002_s13 = smov 8  }
  0x3d   : > { %1773 = dma.hbm_to_vmem [thread:$0]  (!%p2089_p11), %s2381_s3, 8192, %s2093_s6, [#allocation6], %s2001_s12, %s2001_s12, %s2002_s13  }
  0x3e   : > { %s2148_s16 = sadd.s32 1, %s1995_s21   ;;  %s29_s23 = sadd.s32 1, %s1991_s20 }
  0x3f   : > { %s26_s17 = ssub.s32 %s1995_s21, %s2148_s16  ;;  %p36_p6 = scmp.ne.s32.totalorder %s1991_s20, %s1987_s19 }
  0x40   : > { %p27_p13 = scmp.eq.s32.totalorder %s26_s17, 0  ;;  %p37_p10 = scmp.eq.s32.totalorder %s1995_s21, 0 }
  0x41   : > { %p2391_p5 = scmp.eq.s32.totalorder %s2059_s22, 1  ;;  %p1784_p9 = scmp.lt.s32.totalorder %s1995_s21, 2 }
  0x42   : > { %s2157_s27 = scalar_select %p27_p13, %s1991_s20, %s29_s23  }
  0x43   : > { %p38_p3 = por %p37_p10, %p36_p6  ;;  %p2161_p7 = por %p2391_p5, %p36_p6 }
  0x44   : > { %s208_s29 = sand.u32 1, %s1991_s20   ;;  %s1132_s6 = sshll.u32 %s1995_s21, 7 }
  0x45   : > { %s2392_s30 = scalar_select %p2161_p7, 1, 0 }
  0x46   : > { %s1131_s7 = sshll.u32 %s208_s29, 3  ;;  %s2171_s10 = scalar_lea.hbm %s2378_s0, %s1132_s6 }
  0x47   : > { %s212_s11 = scalar_lea.vmem [#allocation2], %s1131_s7  ;;  %p2175_p11 = pnand %p1784_p9, %p38_p3 }
  0x48   : > { %s219_s28 = sshll.u32 %s212_s11, 4  ;;  %s209_s13 = scalar_lea.sflag [#allocation3], %s208_s29  ;;  %s2173_s28 = int_to_ptr.vmem [resolvable:$true] %s219_s28 }
  0x49   : > { %s1895_s14 = scalar_lea.hbm %s2171_s10, 128  ;;  %p1897_p0 = pneg %p2175_p11 }
  0x4a   : > { %p1896_p12 = scmp.ne.s32.totalorder %s2171_s10, %s1895_s14  ;;  %s1900_s23 = scalar_lea.hbm %s2378_s0, 256 }
  0x4b   : > { %p1901_p13 = scmp.lt.u32.totalorder %s2171_s10, %s2378_s0  ;;  %p1902_p6 = scmp.lt.u32.totalorder %s1900_s23, %s1895_s14 }
  0x4c   : > { %p1898_p2 = pnand %p1897_p0, %p1896_p12  ;;  %p1904_p3 = scmp.lt.u32.totalorder %s1895_s14, %s2171_s10 }
  0x4d   : > { %p1903_p10 = por %p1902_p6, %p1901_p13 }
  0x4e   : > { %p1899_p1 = pneg %p1898_p2 }
  0x4f   : > { %p1905_p5 = por %p1904_p3, %p1903_p10 }
  0x51   : > { %p1906_p9 = pnand %p1905_p5, %p1899_p1 }
  0x53   : > { %1909 = shalt.err (!%p1906_p9)
}
  0x54   : > { %s1910_s29 = scalar_lea.vmem %s2173_s28, 128  ;;  %s2003_s8 = smov [#allocation2]  }
  0x55   : > { %p1911_p12 = scmp.ne.s32.totalorder %s2173_s28, %s1910_s29  ;;  %s1915_s9 = sshll.u32 %s2003_s8, 4  ;;  %s1916_s9 = int_to_ptr.vmem [resolvable:$false] %s1915_s9 }
  0x56   : > { %s1917_s11 = scalar_lea.vmem %s1916_s9, 256  ;;  %p1918_p4 = scmp.lt.s32.totalorder %s2173_s28, %s1916_s9 }
  0x57   : > { %p1913_p2 = pnand %p1911_p12, %p1897_p0  ;;  %p1919_p13 = scmp.lt.s32.totalorder %s1917_s11, %s1910_s29 }
  0x59   : > { %p1914_p7 = pneg %p1913_p2  ;;  %p1920_p6 = por %p1919_p13, %p1918_p4 }
  0x5b   : > { %p1921_p10 = pnand %p1920_p6, %p1914_p7 }
  0x5d   : > { %1924 = shalt.err (!%p1921_p10)
}
  0x5e   : > { %1777 = dma.hbm_to_vmem [thread:$0]  (!%p2175_p11), %s2171_s10, 128, %s2173_s28, %s209_s13  }
  0x5f   : > { %228 = sbr.rel (%p2078_p8) target bundleno = 915 (0x393), region = 40  ;;  %s2207_s14 = sand.u32 (!%p2078_p8), 1, %s1987_s19  }
  0x60   : > { %s1134_s15 = sshll.u32 (!%p2078_p8), %s2207_s14, 3  ;;  %s231_s17 = scalar_lea.sflag (!%p2078_p8), [#allocation3], %s2207_s14 }
  0x61   : > { %s2213_s23 = scalar_lea.vmem (!%p2078_p8), [#allocation2], %s1134_s15  ;;  %p2394_p4 = scmp.ne.s32.totalorder (!%p2078_p8), %s2387_s24, 0 }
  0x66   : > { %1970 = dma.done.wait (%p2394_p4), %s231_s17, 128  }
  0x67   : > { %1972 = vsyncadd (%p2394_p4), %s231_s17, 4294967168  ;;  %p2395_p7 = scmp.eq.s32.totalorder %s2059_s22, 0 }
  0x69   : > { %1974 = dma.done.wait (%p2395_p7), [#allocation6], 16384   ;;  %p2396_p8 = pmov %p2395_p7 }
  0x6a   : > { %v2004_v0 = vmov 0.0|0.0   ;;  %vm2005_vm0 = vmmov 0   ;;  %v2006_v1 = vmov 0.0   ;;  %v270_v2 = vld [vmem:[#allocation5] sm:$0xff]  ;;  %v385_v4 = vld [vmem:[#allocation5 + $0x8] sm:$0xff]  ;;  %v2244_v54 = vld [vmem:[%s2213_s23] sm:$0xff] }
  0x6b   : > { %1976 = vsyncadd (%p2396_p8), [#allocation6], 4294950912  ;;  %1563 = vmatprep.subr.bf16.mxu0 %v2004_v0  ;;  %1587 = vmatprep.subr.bf16.mxu1 %v2004_v0  ;;  %v271_v3 = vld [vmem:[#allocation5 + $0x20] sm:$0xff]  ;;  %v386_v6 = vld [vmem:[#allocation5 + $0x28] sm:$0xff]  ;;  %s1144_s9 = sshll.u32 %s2059_s22, 7  ;;  %s268_s11 = scalar_lea.vmem [#allocation8], %s1134_s15 }
  0x6c   : > { %1315 = vmatprep.mubr.msk.f32.mxu0 %vm2005_vm0, %v2006_v1  ;;  %1350 = vmatprep.mubr.msk.f32.mxu1 %vm2005_vm0, %v2006_v1  ;;  %v1564_v5 = vpack.c.bf16 %v271_v3, %v270_v2  ;;  %v272_v7 = vld [vmem:[#allocation5 + $0x40] sm:$0xff]  ;;  %v1588_v9 = vpack.c.bf16 %v386_v6, %v385_v4  ;;  %v387_v10 = vld [vmem:[#allocation5 + $0x48] sm:$0xff]  ;;  %v485_v57 = vld [vmem:[#allocation7 + $0x90] sm:$0xff]  ;;  %s1037_s17 = sshll.u32 %s268_s11, 4  ;;  %s2334_s26 = scalar_lea.hbm %s2383_s5, %s1144_s9  ;;  %s2336_s17 = int_to_ptr.vmem [resolvable:$true] %s1037_s17 }
  0x6d   : > { %v273_v8 = vld [vmem:[#allocation5 + $0x60] sm:$0xff]  ;;  %v388_v11 = vld [vmem:[#allocation5 + $0x68] sm:$0xff]  ;;  %v486_v58 = vld [vmem:[#allocation7 + $0x98] sm:$0xff]  ;;  %s1024_s10 = scalar_lea.sflag [#allocation4], %s2207_s14  ;;  %s1925_s28 = scalar_lea.vmem %s2336_s17, 128 }
  0x6e   : > { %1565 = vmatpush3.bf16.msra.mxu0 %v1564_v5  ;;  %v1567_v12 = vpack.c.bf16 %v273_v8, %v272_v7  ;;  %1589 = vmatpush3.bf16.msra.mxu1 %v1588_v9  ;;  %v1591_v13 = vpack.c.bf16 %v388_v11, %v387_v10  ;;  %v274_v14 = vld [vmem:[#allocation5 + $0x80] sm:$0xff]  ;;  %v389_v16 = vld [vmem:[#allocation5 + $0x88] sm:$0xff]  ;;  %v371_v59 = vld [vmem:[#allocation7 + $0x10] sm:$0xff]  ;;  %v1615_v61 = vpack.c.bf16 %v486_v58, %v485_v57  ;;  %p1926_p11 = scmp.ne.s32.totalorder %s2336_s17, %s1925_s28  ;;  %p2397_p0 = scmp.ne.s32.totalorder %s2392_s30, 0 }
  0x6f   : > { %1566 = vmatprep.subr.bf16.mxu0 %v2004_v0  ;;  %v275_v15 = vld [vmem:[#allocation5 + $0xa0] sm:$0xff]  ;;  %1590 = vmatprep.subr.bf16.mxu1 %v2004_v0  ;;  %v390_v17 = vld [vmem:[#allocation5 + $0xa8] sm:$0xff]  ;;  %v372_v60 = vld [vmem:[#allocation7 + $0x18] sm:$0xff]  ;;  %s2007_s22 = smov [#allocation8]  }
  0x70   : > { %v1570_v18 = vpack.c.bf16 %v275_v15, %v274_v14  ;;  %v1594_v19 = vpack.c.bf16 %v390_v17, %v389_v16  ;;  %v276_v20 = vld [vmem:[#allocation5 + $0xc0] sm:$0xff]  ;;  %v391_v22 = vld [vmem:[#allocation5 + $0xc8] sm:$0xff]  ;;  %v1639_v62 = vpack.c.bf16 %v372_v60, %v371_v59  ;;  %v489_v7 = vld [vmem:[#allocation7 + $0xb0] sm:$0xff]  ;;  %p1927_p1 = pnand %p1926_p11, %p2397_p0  ;;  %s1929_s15 = sshll.u32 %s2007_s22, 4  ;;  %s1930_s15 = int_to_ptr.vmem [resolvable:$false] %s1929_s15 }
  0x71   : > { %v277_v21 = vld [vmem:[#allocation5 + $0xe0] sm:$0xff]  ;;  %v392_v23 = vld [vmem:[#allocation5 + $0xe8] sm:$0xff]  ;;  %v490_v8 = vld [vmem:[#allocation7 + $0xb8] sm:$0xff]  ;;  %s1931_s12 = scalar_lea.vmem %s1930_s15, 256  ;;  %p1932_p5 = scmp.lt.s32.totalorder %s2336_s17, %s1930_s15 }
  0x72   : > { %1568 = vmatpush3.bf16.msra.mxu0 %v1567_v12  ;;  %1592 = vmatpush3.bf16.msra.mxu1 %v1591_v13  ;;  %v1573_v24 = vpack.c.bf16 %v277_v21, %v276_v20  ;;  %v1597_v25 = vpack.c.bf16 %v392_v23, %v391_v22  ;;  %v278_v26 = vld [vmem:[#allocation5 + $0x100] sm:$0xff]  ;;  %v393_v28 = vld [vmem:[#allocation5 + $0x108] sm:$0xff]  ;;  %v1621_v9 = vpack.c.bf16 %v490_v8, %v489_v7  ;;  %v375_v10 = vld [vmem:[#allocation7 + $0x30] sm:$0xff]  ;;  %p1928_p3 = pneg %p1927_p1  ;;  %p1933_p9 = scmp.lt.s32.totalorder %s1931_s12, %s1925_s28 }
  0x73   : > { %1569 = vmatprep.subr.bf16.mxu0 %v2004_v0  ;;  %1593 = vmatprep.subr.bf16.mxu1 %v2004_v0  ;;  %v279_v27 = vld [vmem:[#allocation5 + $0x120] sm:$0xff]  ;;  %v394_v29 = vld [vmem:[#allocation5 + $0x128] sm:$0xff]  ;;  %v376_v11 = vld [vmem:[#allocation7 + $0x38] sm:$0xff] }
  0x74   : > { %v1576_v30 = vpack.c.bf16 %v279_v27, %v278_v26  ;;  %v1600_v31 = vpack.c.bf16 %v394_v29, %v393_v28  ;;  %v280_v32 = vld [vmem:[#allocation5 + $0x140] sm:$0xff]  ;;  %v395_v34 = vld [vmem:[#allocation5 + $0x148] sm:$0xff]  ;;  %v1645_v12 = vpack.c.bf16 %v376_v11, %v375_v10  ;;  %v494_v20 = vld [vmem:[#allocation7 + $0xd8] sm:$0xff]  ;;  %p1934_p12 = por %p1933_p9, %p1932_p5 }
  0x75   : > { %v281_v33 = vld [vmem:[#allocation5 + $0x160] sm:$0xff]  ;;  %v396_v35 = vld [vmem:[#allocation5 + $0x168] sm:$0xff]  ;;  %v379_v22 = vld [vmem:[#allocation7 + $0x50] sm:$0xff] }
  0x76   : > { %1571 = vmatpush3.bf16.msra.mxu0 %v1570_v18  ;;  %1595 = vmatpush3.bf16.msra.mxu1 %v1594_v19  ;;  %v1579_v36 = vpack.c.bf16 %v281_v33, %v280_v32  ;;  %v1603_v37 = vpack.c.bf16 %v396_v35, %v395_v34  ;;  %v282_v38 = vld [vmem:[#allocation5 + $0x180] sm:$0xff]  ;;  %v397_v40 = vld [vmem:[#allocation5 + $0x188] sm:$0xff]  ;;  %v493_v19 = vld [vmem:[#allocation7 + $0xd0] sm:$0xff]  ;;  %p1935_p2 = pnand %p1934_p12, %p1928_p3 }
  0x77   : > { %1572 = vmatprep.subr.bf16.mxu0 %v2004_v0  ;;  %1596 = vmatprep.subr.bf16.mxu1 %v2004_v0  ;;  %v283_v39 = vld [vmem:[#allocation5 + $0x1a0] sm:$0xff]  ;;  %v398_v41 = vld [vmem:[#allocation5 + $0x1a8] sm:$0xff]  ;;  %v1627_v21 = vpack.c.bf16 %v494_v20, %v493_v19  ;;  %v380_v23 = vld [vmem:[#allocation7 + $0x58] sm:$0xff] }
  0x78   : > { %v1582_v42 = vpack.c.bf16 %v283_v39, %v282_v38  ;;  %v1606_v43 = vpack.c.bf16 %v398_v41, %v397_v40  ;;  %v284_v44 = vld [vmem:[#allocation5 + $0x1c0] sm:$0xff]  ;;  %v399_v46 = vld [vmem:[#allocation5 + $0x1c8] sm:$0xff]  ;;  %v498_v32 = vld [vmem:[#allocation7 + $0xf8] sm:$0xff] }
  0x79   : > { %v285_v45 = vld [vmem:[#allocation5 + $0x1e0] sm:$0xff]  ;;  %v400_v47 = vld [vmem:[#allocation5 + $0x1e8] sm:$0xff]  ;;  %v383_v34 = vld [vmem:[#allocation7 + $0x70] sm:$0xff] }
  0x7a   : > { %1574 = vmatpush3.bf16.msra.mxu0 %v1573_v24  ;;  %1598 = vmatpush3.bf16.msra.mxu1 %v1597_v25  ;;  %v1585_v48 = vpack.c.bf16 %v285_v45, %v284_v44  ;;  %v1609_v49 = vpack.c.bf16 %v400_v47, %v399_v46  ;;  %v483_v50 = vld [vmem:[#allocation7 + $0x80] sm:$0xff]  ;;  %v484_v51 = vld [vmem:[#allocation7 + $0x88] sm:$0xff]  ;;  %v1651_v24 = vpack.c.bf16 %v380_v23, %v379_v22  ;;  %v384_v35 = vld [vmem:[#allocation7 + $0x78] sm:$0xff] }
  0x7b   : > { %1575 = vmatprep.subr.bf16.mxu0 %v2004_v0  ;;  %1599 = vmatprep.subr.bf16.mxu1 %v2004_v0  ;;  %v369_v52 = vld [vmem:[#allocation7] sm:$0xff]  ;;  %v370_v53 = vld [vmem:[#allocation7 + $0x8] sm:$0xff]  ;;  %v1612_v55 = vpack.c.bf16 %v484_v51, %v483_v50  ;;  %v1139_v38 = vld [vmem:[%s2380_s2 + $0x1] ss:$0 sm:$0xff] }
  0x7c   : > { %v1636_v56 = vpack.c.bf16 %v370_v53, %v369_v52  ;;  %v487_v63 = vld [vmem:[#allocation7 + $0xa0] sm:$0xff]  ;;  %v488_v2 = vld [vmem:[#allocation7 + $0xa8] sm:$0xff]  ;;  %v640_v50 = vld [vmem:[#allocation5 + $0x30] sm:$0xff] }
  0x7d   : > { %v373_v3 = vld [vmem:[#allocation7 + $0x20] sm:$0xff]  ;;  %v374_v4 = vld [vmem:[#allocation7 + $0x28] sm:$0xff]  ;;  %v1618_v5 = vpack.c.bf16 %v488_v2, %v487_v63  ;;  %v641_v59 = vld [vmem:[#allocation5 + $0x50] sm:$0xff] }
  0x7e   : > { %1577 = vmatpush3.bf16.msra.mxu0 %v1576_v30  ;;  %1601 = vmatpush3.bf16.msra.mxu1 %v1600_v31  ;;  %v1642_v6 = vpack.c.bf16 %v374_v4, %v373_v3  ;;  %v491_v13 = vld [vmem:[#allocation7 + $0xc0] sm:$0xff]  ;;  %v492_v14 = vld [vmem:[#allocation7 + $0xc8] sm:$0xff]  ;;  %v497_v31 = vld [vmem:[#allocation7 + $0xf0] sm:$0xff] }
  0x7f   : > { %1578 = vmatprep.subr.bf16.mxu0 %v2004_v0  ;;  %1602 = vmatprep.subr.bf16.mxu1 %v2004_v0  ;;  %v1624_v15 = vpack.c.bf16 %v492_v14, %v491_v13  ;;  %v377_v16 = vld [vmem:[#allocation7 + $0x40] sm:$0xff]  ;;  %v378_v17 = vld [vmem:[#allocation7 + $0x48] sm:$0xff]  ;;  %v1633_v33 = vpack.c.bf16 %v498_v32, %v497_v31  ;;  %v642_v60 = vld [vmem:[#allocation5 + $0x70] sm:$0xff] }
  0x80   : > { %v1648_v18 = vpack.c.bf16 %v378_v17, %v377_v16  ;;  %v495_v25 = vld [vmem:[#allocation7 + $0xe0] sm:$0xff]  ;;  %v496_v26 = vld [vmem:[#allocation7 + $0xe8] sm:$0xff]  ;;  %v644_v63 = vld [vmem:[#allocation5 + $0xb0] sm:$0xff] }
  0x81   : > { %v1630_v27 = vpack.c.bf16 %v496_v26, %v495_v25  ;;  %v381_v28 = vld [vmem:[#allocation7 + $0x60] sm:$0xff]  ;;  %v382_v29 = vld [vmem:[#allocation7 + $0x68] sm:$0xff]  ;;  %v645_v3 = vld [vmem:[#allocation5 + $0xd0] sm:$0xff] }
  0x82   : > { %1580 = vmatpush3.bf16.msra.mxu0 %v1579_v36  ;;  %1604 = vmatpush3.bf16.msra.mxu1 %v1603_v37  ;;  %v1654_v30 = vpack.c.bf16 %v382_v29, %v381_v28  ;;  %v1657_v36 = vpack.c.bf16 %v384_v35, %v383_v34  ;;  %v1138_v37 = vld [vmem:[%s2380_s2] ss:$0 sm:$0xff]  ;;  %v825_v19 = vld [vmem:[#allocation5 + $0x38] sm:$0xff] }
  0x83   : > { %1581 = vmatprep.subr.bf16.mxu0 %v2004_v0  ;;  %1605 = vmatprep.subr.bf16.mxu1 %v2004_v0  ;;  %v646_v4 = vld [vmem:[#allocation5 + $0xf0] sm:$0xff]  ;;  %v827_v22 = vld [vmem:[#allocation5 + $0x78] sm:$0xff] }
  0x84   : > { %v648_v7 = vld [vmem:[#allocation5 + $0x130] sm:$0xff]  ;;  %v829_v25 = vld [vmem:[#allocation5 + $0xb8] sm:$0xff] }
  0x85   : > { %v650_v10 = vld [vmem:[#allocation5 + $0x170] sm:$0xff]  ;;  %v831_v28 = vld [vmem:[#allocation5 + $0xf8] sm:$0xff] }
  0x86   : > { %1583 = vmatpush3.bf16.msra.mxu0 %v1582_v42  ;;  %1607 = vmatpush3.bf16.msra.mxu1 %v1606_v43  ;;  %v652_v13 = vld [vmem:[#allocation5 + $0x1b0] sm:$0xff]  ;;  %v833_v31 = vld [vmem:[#allocation5 + $0x138] sm:$0xff] }
  0x87   : > { %1584 = vmatprep.subr.bf16.mxu0 %v2004_v0  ;;  %1608 = vmatprep.subr.bf16.mxu1 %v2004_v0  ;;  %v654_v16 = vld [vmem:[#allocation5 + $0x1f0] sm:$0xff]  ;;  %v835_v34 = vld [vmem:[#allocation5 + $0x178] sm:$0xff] }
  0x8a   : > { %1586 = vmatpush3.bf16.msra.mxu0 %v1585_v48  ;;  %1610 = vmatpush3.bf16.msra.mxu1 %v1609_v49  ;;  %v639_v49 = vld [vmem:[#allocation5 + $0x10] sm:$0xff] }
  0x8b   : > { %1611 = vmatprep.subr.bf16.mxu0 %v2004_v0  ;;  %1635 = vmatprep.subr.bf16.mxu1 %v2004_v0  ;;  %v1660_v57 = vpack.c.bf16 %v640_v50, %v639_v49  ;;  %v742_v49 = vld [vmem:[#allocation7 + $0x128] sm:$0xff] }
  0x8d   : > { %1316 = vmatmul.mubr.f32.vlgmr.msra.gmra.mrb[0].mxu0 %v2244_v54  ;;  %1351 = vmatmul.mubr.f32.vlgmr.msra.gmra.mrb[0].mxu1 %v2244_v54 }
  0x8e   : > { %1613 = vmatpush3.bf16.msra.mxu0 %v1612_v55  ;;  %1637 = vmatpush3.bf16.msra.mxu1 %v1636_v56 }
  0x8f   : > { %1614 = vmatprep.subr.bf16.mxu0 %v2004_v0  ;;  %1638 = vmatprep.subr.bf16.mxu1 %v2004_v0 }
  0x90   : > { %1385 = vmatprep.mubr.msk.f32.mxu0 %vm2005_vm0, %v2006_v1  ;;  %1420 = vmatprep.mubr.msk.f32.mxu1 %vm2005_vm0, %v2006_v1 }
  0x92   : > { %1616 = vmatpush3.bf16.msra.mxu0 %v1615_v61  ;;  %1640 = vmatpush3.bf16.msra.mxu1 %v1639_v62  ;;  %v1663_v61 = vpack.c.bf16 %v642_v60, %v641_v59  ;;  %v643_v62 = vld [vmem:[#allocation5 + $0x90] sm:$0xff]  ;;  %v749_v60 = vld [vmem:[#allocation7 + $0x160] sm:$0xff] }
  0x93   : > { %1617 = vmatprep.subr.bf16.mxu0 %v2004_v0  ;;  %1641 = vmatprep.subr.bf16.mxu1 %v2004_v0  ;;  %v1666_v2 = vpack.c.bf16 %v644_v63, %v643_v62  ;;  %v751_v63 = vld [vmem:[#allocation7 + $0x170] sm:$0xff] }
  0x96   : > { %1619 = vmatpush3.bf16.msra.mxu0 %v1618_v5  ;;  %1643 = vmatpush3.bf16.msra.mxu1 %v1642_v6  ;;  %v1669_v5 = vpack.c.bf16 %v646_v4, %v645_v3  ;;  %v647_v6 = vld [vmem:[#allocation5 + $0x110] sm:$0xff] }
  0x97   : > { %1620 = vmatprep.subr.bf16.mxu0 %v2004_v0  ;;  %1644 = vmatprep.subr.bf16.mxu1 %v2004_v0  ;;  %v1672_v8 = vpack.c.bf16 %v648_v7, %v647_v6 }
  0x9a   : > { %1622 = vmatpush3.bf16.msra.mxu0 %v1621_v9  ;;  %1646 = vmatpush3.bf16.msra.mxu1 %v1645_v12  ;;  %v649_v9 = vld [vmem:[#allocation5 + $0x150] sm:$0xff] }
  0x9b   : > { %1623 = vmatprep.subr.bf16.mxu0 %v2004_v0  ;;  %1647 = vmatprep.subr.bf16.mxu1 %v2004_v0  ;;  %v1675_v11 = vpack.c.bf16 %v650_v10, %v649_v9  ;;  %v651_v12 = vld [vmem:[#allocation5 + $0x190] sm:$0xff] }
  0x9c   : > { %v1678_v14 = vpack.c.bf16 %v652_v13, %v651_v12  ;;  %v1140_v9 = vld [vmem:[%s2380_s2 + $0x2] ss:$0 sm:$0xff] }
  0x9e   : > { %1625 = vmatpush3.bf16.msra.mxu0 %v1624_v15  ;;  %1649 = vmatpush3.bf16.msra.mxu1 %v1648_v18  ;;  %v653_v15 = vld [vmem:[#allocation5 + $0x1d0] sm:$0xff]  ;;  %v824_v18 = vld [vmem:[#allocation5 + $0x18] sm:$0xff] }
  0x9f   : > { %1626 = vmatprep.subr.bf16.mxu0 %v2004_v0  ;;  %1650 = vmatprep.subr.bf16.mxu1 %v2004_v0  ;;  %v1681_v17 = vpack.c.bf16 %v654_v16, %v653_v15  ;;  %v1708_v20 = vpack.c.bf16 %v825_v19, %v824_v18  ;;  %v923_v15 = vld [vmem:[#allocation7 + $0x188] sm:$0xff] }
  0xa2   : > { %1628 = vmatpush3.bf16.msra.mxu0 %v1627_v21  ;;  %1652 = vmatpush3.bf16.msra.mxu1 %v1651_v24  ;;  %v826_v21 = vld [vmem:[#allocation5 + $0x58] sm:$0xff] }
  0xa3   : > { %1629 = vmatprep.subr.bf16.mxu0 %v2004_v0  ;;  %1653 = vmatprep.subr.bf16.mxu1 %v2004_v0  ;;  %v1711_v23 = vpack.c.bf16 %v827_v22, %v826_v21  ;;  %v828_v24 = vld [vmem:[#allocation5 + $0x98] sm:$0xff]  ;;  %v924_v21 = vld [vmem:[#allocation7 + $0x190] sm:$0xff] }
  0xa4   : > { %v1714_v26 = vpack.c.bf16 %v829_v25, %v828_v24  ;;  %v925_v22 = vld [vmem:[#allocation7 + $0x198] sm:$0xff]  ;;  %v926_v24 = vld [vmem:[#allocation7 + $0x1a0] sm:$0xff]  ;;  %v927_v25 = vld [vmem:[#allocation7 + $0x1a8] sm:$0xff] }
  0xa6   : > { %1631 = vmatpush3.bf16.msra.mxu0 %v1630_v27  ;;  %1655 = vmatpush3.bf16.msra.mxu1 %v1654_v30  ;;  %v830_v27 = vld [vmem:[#allocation5 + $0xd8] sm:$0xff] }
  0xa7   : > { %1632 = vmatprep.subr.bf16.mxu0 %v2004_v0  ;;  %1656 = vmatprep.subr.bf16.mxu1 %v2004_v0  ;;  %v1717_v29 = vpack.c.bf16 %v831_v28, %v830_v27  ;;  %v832_v30 = vld [vmem:[#allocation5 + $0x118] sm:$0xff]  ;;  %v928_v27 = vld [vmem:[#allocation7 + $0x1b0] sm:$0xff] }
  0xa8   : > { %v1720_v32 = vpack.c.bf16 %v833_v31, %v832_v30  ;;  %v929_v28 = vld [vmem:[#allocation7 + $0x1b8] sm:$0xff]  ;;  %v1141_v30 = vld [vmem:[%s2380_s2 + $0x3] ss:$0 sm:$0xff]  ;;  %v930_v31 = vld [vmem:[#allocation7 + $0x1c0] sm:$0xff] }
  0xaa   : > { %1634 = vmatpush3.bf16.msra.mxu0 %v1633_v33  ;;  %1658 = vmatpush3.bf16.msra.mxu1 %v1657_v36  ;;  %v834_v33 = vld [vmem:[#allocation5 + $0x158] sm:$0xff] }
  0xab   : > { %1659 = vmatprep.subr.bf16.mxu0 %v2004_v0  ;;  %1683 = vmatprep.subr.bf16.mxu1 %v2004_v0  ;;  %v1723_v35 = vpack.c.bf16 %v835_v34, %v834_v33  ;;  %v836_v36 = vld [vmem:[#allocation5 + $0x198] sm:$0xff] }
 0x160   : > { %v359_v39 = vpop.f32.mrb[0].mxu0  ;;  %v474_v41 = vpop.f32.mrb[0].mxu1 }
 0x161   : > { %v360_v40 = vadd.f32 %v1138_v37, %v359_v39  ;;  %v1317_v42 = vpop.f32.mrb[1].mxu0  ;;  %v475_v43 = vadd.f32 %v1139_v38, %v474_v41  ;;  %v1352_v44 = vpop.f32.mrb[1].mxu1  ;;  %v837_v37 = vld [vmem:[#allocation5 + $0x1b8] sm:$0xff] }
 0x162   : > { %v1726_v38 = vpack.c.bf16 %v837_v37, %v836_v36  ;;  %v838_v39 = vld [vmem:[#allocation5 + $0x1d8] sm:$0xff]  ;;  %v737_v42 = vld [vmem:[#allocation7 + $0x100] sm:$0xff]  ;;  %v739_v44 = vld [vmem:[#allocation7 + $0x110] sm:$0xff] }
 0x163   : > { %v365_v45 = vmul.f32 0.70710677, %v360_v40  ;;  %v479_v46 = vmul.f32 0.70710677, %v475_v43  ;;  %v363_v47 = vmul.f32 0.5, %v360_v40  ;;  %v478_v53 = vmul.f32 0.5, %v475_v43 }
 0x164   : > { %v839_v40 = vld [vmem:[#allocation5 + $0x1f8] sm:$0xff]  ;;  %v738_v43 = vld [vmem:[#allocation7 + $0x108] sm:$0xff]  ;;  %v932_v36 = vld [vmem:[#allocation7 + $0x1d0] sm:$0xff] }
 0x165   : > { %1829 = verf.f32 %v365_v45  ;;  %v1729_v41 = vpack.c.bf16 %v839_v40, %v838_v39  ;;  %v1684_v45 = vpack.c.bf16 %v738_v43, %v737_v42  ;;  %v933_v37 = vld [vmem:[#allocation7 + $0x1d8] sm:$0xff]  ;;  %v934_v40 = vld [vmem:[#allocation7 + $0x1e0] sm:$0xff]  ;;  %v936_v43 = vld [vmem:[#allocation7 + $0x1f0] sm:$0xff] }
 0x166   : > { %1831 = verf.f32 %v479_v46  ;;  %v740_v46 = vld [vmem:[#allocation7 + $0x118] sm:$0xff]  ;;  %v1747_v39 = vpack.c.bf16 %v933_v37, %v932_v36 }
 0x16f   : > { %v1830_v48 = vpop.eup %1829 }
 0x170   : > { %v1832_v51 = vpop.eup %1831  ;;  %v367_v52 = vadd.f32 1.0, %v1830_v48  ;;  %v741_v48 = vld [vmem:[#allocation7 + $0x120] sm:$0xff] }
 0x171   : > { %v481_v55 = vadd.f32 1.0, %v1832_v51  ;;  %v1690_v50 = vpack.c.bf16 %v742_v49, %v741_v48  ;;  %v743_v51 = vld [vmem:[#allocation7 + $0x130] sm:$0xff] }
 0x172   : > { %v368_v56 = vmul.f32 %v367_v52, %v363_v47  ;;  %v1687_v47 = vpack.c.bf16 %v740_v46, %v739_v44  ;;  %v937_v44 = vld [vmem:[#allocation7 + $0x1f8] sm:$0xff] }
 0x173   : > { %v482_v58 = vmul.f32 %v481_v55, %v478_v53  ;;  %v745_v53 = vld [vmem:[#allocation7 + $0x140] sm:$0xff]  ;;  %v746_v55 = vld [vmem:[#allocation7 + $0x148] sm:$0xff] }
 0x174   : > { %1421 = vmatmul.mubr.f32.vlgmr.msra.gmra.mrb[2].mxu1 %v368_v56  ;;  %v1696_v56 = vpack.c.bf16 %v746_v55, %v745_v53  ;;  %v1142_v53 = vld [vmem:[%s2382_s4] ss:$0 sm:$0xff] }
 0x175   : > { %1386 = vmatmul.mubr.f32.vlgmr.msra.gmra.mrb[2].mxu0 %v482_v58  ;;  %1490 = vmatprep.mubr.msk.f32.mxu1 %vm2005_vm0, %v2006_v1  ;;  %v748_v58 = vld [vmem:[#allocation7 + $0x158] sm:$0xff] }
 0x176   : > { %1661 = vmatpush3.bf16.msra.mxu0 %v1660_v57  ;;  %1455 = vmatprep.mubr.msk.f32.mxu0 %vm2005_vm0, %v2006_v1  ;;  %v747_v57 = vld [vmem:[#allocation7 + $0x150] sm:$0xff] }
 0x177   : > { %1662 = vmatprep.subr.bf16.mxu0 %v2004_v0  ;;  %1685 = vmatpush3.bf16.msra.mxu1 %v1684_v45  ;;  %v1699_v59 = vpack.c.bf16 %v748_v58, %v747_v57  ;;  %v1753_v45 = vpack.c.bf16 %v937_v44, %v936_v43 }
 0x178   : > { %1686 = vmatprep.subr.bf16.mxu1 %v2004_v0 }
 0x17a   : > { %1664 = vmatpush3.bf16.msra.mxu0 %v1663_v61  ;;  %v750_v61 = vld [vmem:[#allocation7 + $0x168] sm:$0xff] }
 0x17b   : > { %1665 = vmatprep.subr.bf16.mxu0 %v2004_v0  ;;  %1688 = vmatpush3.bf16.msra.mxu1 %v1687_v47  ;;  %v1702_v62 = vpack.c.bf16 %v750_v61, %v749_v60 }
 0x17c   : > { %1689 = vmatprep.subr.bf16.mxu1 %v2004_v0 }
 0x17e   : > { %1667 = vmatpush3.bf16.msra.mxu0 %v1666_v2  ;;  %v752_v2 = vld [vmem:[#allocation7 + $0x178] sm:$0xff] }
 0x17f   : > { %1668 = vmatprep.subr.bf16.mxu0 %v2004_v0  ;;  %1691 = vmatpush3.bf16.msra.mxu1 %v1690_v50  ;;  %v1705_v3 = vpack.c.bf16 %v752_v2, %v751_v63 }
 0x180   : > { %1692 = vmatprep.subr.bf16.mxu1 %v2004_v0 }
 0x182   : > { %1670 = vmatpush3.bf16.msra.mxu0 %v1669_v5 }
 0x183   : > { %1671 = vmatprep.subr.bf16.mxu0 %v2004_v0 }
 0x186   : > { %1673 = vmatpush3.bf16.msra.mxu0 %v1672_v8 }
 0x187   : > { %1674 = vmatprep.subr.bf16.mxu0 %v2004_v0 }
 0x18a   : > { %1676 = vmatpush3.bf16.msra.mxu0 %v1675_v11 }
 0x18b   : > { %1677 = vmatprep.subr.bf16.mxu0 %v2004_v0 }
 0x18e   : > { %1679 = vmatpush3.bf16.msra.mxu0 %v1678_v14  ;;  %v922_v14 = vld [vmem:[#allocation7 + $0x180] sm:$0xff] }
 0x18f   : > { %1680 = vmatprep.subr.bf16.mxu0 %v2004_v0  ;;  %v1732_v19 = vpack.c.bf16 %v923_v15, %v922_v14 }
 0x192   : > { %1682 = vmatpush3.bf16.msra.mxu0 %v1681_v17 }
 0x193   : > { %1707 = vmatprep.subr.bf16.mxu0 %v2004_v0 }
 0x195   : > { %1456 = vmatmul.mubr.f32.vlgmr.msra.gmra.mrb[4].mxu0 %v2244_v54 }
 0x196   : > { %1709 = vmatpush3.bf16.msra.mxu0 %v1708_v20  ;;  %1525 = vmatprep.mubr.msk.f32.mxu0 %vm2005_vm0, %v2006_v1 }
 0x197   : > { %1710 = vmatprep.subr.bf16.mxu0 %v2004_v0 }
 0x19a   : > { %1712 = vmatpush3.bf16.msra.mxu0 %v1711_v23  ;;  %v1735_v23 = vpack.c.bf16 %v925_v22, %v924_v21 }
 0x19b   : > { %1713 = vmatprep.subr.bf16.mxu0 %v2004_v0 }
 0x19e   : > { %1715 = vmatpush3.bf16.msra.mxu0 %v1714_v26  ;;  %v1738_v26 = vpack.c.bf16 %v927_v25, %v926_v24 }
 0x19f   : > { %1716 = vmatprep.subr.bf16.mxu0 %v2004_v0 }
 0x1a2   : > { %1718 = vmatpush3.bf16.msra.mxu0 %v1717_v29  ;;  %v1741_v29 = vpack.c.bf16 %v929_v28, %v928_v27 }
 0x1a3   : > { %1719 = vmatprep.subr.bf16.mxu0 %v2004_v0 }
 0x1a6   : > { %1721 = vmatpush3.bf16.msra.mxu0 %v1720_v32 }
 0x1a7   : > { %1722 = vmatprep.subr.bf16.mxu0 %v2004_v0 }
 0x1aa   : > { %1724 = vmatpush3.bf16.msra.mxu0 %v1723_v35 }
 0x1ab   : > { %1725 = vmatprep.subr.bf16.mxu0 %v2004_v0 }
 0x1ae   : > { %1727 = vmatpush3.bf16.msra.mxu0 %v1726_v38 }
 0x1af   : > { %1728 = vmatprep.subr.bf16.mxu0 %v2004_v0 }
 0x1b2   : > { %1730 = vmatpush3.bf16.msra.mxu0 %v1729_v41  ;;  %v935_v41 = vld [vmem:[#allocation7 + $0x1e8] sm:$0xff] }
 0x1b3   : > { %v1750_v42 = vpack.c.bf16 %v935_v41, %v934_v40 }
 0x1b5   : > { %1526 = vmatmul.mubr.f32.vlgmr.msra.gmra.mrb[6].mxu0 %v2244_v54  ;;  %v744_v54 = vld [vmem:[#allocation7 + $0x138] sm:$0xff] }
 0x1b6   : > { %v1693_v52 = vpack.c.bf16 %v744_v54, %v743_v51 }
 0x1b8   : > { %1694 = vmatpush3.bf16.msra.mxu1 %v1693_v52 }
 0x1b9   : > { %1695 = vmatprep.subr.bf16.mxu1 %v2004_v0 }
 0x1bc   : > { %1697 = vmatpush3.bf16.msra.mxu1 %v1696_v56 }
 0x1bd   : > { %1698 = vmatprep.subr.bf16.mxu1 %v2004_v0 }
 0x1c0   : > { %1700 = vmatpush3.bf16.msra.mxu1 %v1699_v59 }
 0x1c1   : > { %1701 = vmatprep.subr.bf16.mxu1 %v2004_v0 }
 0x1c4   : > { %1703 = vmatpush3.bf16.msra.mxu1 %v1702_v62 }
 0x1c5   : > { %1704 = vmatprep.subr.bf16.mxu1 %v2004_v0 }
 0x1c8   : > { %1706 = vmatpush3.bf16.msra.mxu1 %v1705_v3 }
 0x1c9   : > { %1731 = vmatprep.subr.bf16.mxu1 %v2004_v0 }
 0x247   : > { %v635_v4 = vpop.f32.mrb[2].mxu1 }
 0x248   : > { %v565_v5 = vpop.f32.mrb[2].mxu0  ;;  %v1422_v6 = vpop.f32.mrb[3].mxu1 }
 0x249   : > { %v2307_v7 = vadd.f32 %v635_v4, %v565_v5  ;;  %v1387_v8 = vpop.f32.mrb[3].mxu0 }
 0x268   : > { %v728_v10 = vpop.f32.mrb[4].mxu0 }
 0x269   : > { %v729_v11 = vadd.f32 %v1140_v9, %v728_v10  ;;  %v1457_v12 = vpop.f32.mrb[5].mxu0 }
 0x26b   : > { %v733_v13 = vmul.f32 0.70710677, %v729_v11  ;;  %v732_v17 = vmul.f32 0.5, %v729_v11 }
 0x26d   : > { %1833 = verf.f32 %v733_v13 }
 0x277   : > { %v1834_v16 = vpop.eup %1833 }
 0x278   : > { %v735_v18 = vadd.f32 1.0, %v1834_v16 }
 0x27a   : > { %v736_v20 = vmul.f32 %v735_v18, %v732_v17 }
 0x27c   : > { %1491 = vmatmul.mubr.f32.vlgmr.msra.gmra.mrb[4].mxu1 %v736_v20 }
 0x27d   : > { %1733 = vmatpush3.bf16.msra.mxu1 %v1732_v19  ;;  %1560 = vmatprep.mubr.msk.f32.mxu1 %vm2005_vm0, %v2006_v1  ;;  %v931_v1 = vld [vmem:[#allocation7 + $0x1c8] sm:$0xff] }
 0x27e   : > { %1734 = vmatprep.subr.bf16.mxu1 %v2004_v0  ;;  %v1744_v35 = vpack.c.bf16 %v931_v1, %v930_v31 }
 0x281   : > { %1736 = vmatpush3.bf16.msra.mxu1 %v1735_v23 }
 0x282   : > { %1737 = vmatprep.subr.bf16.mxu1 %v2004_v0 }
 0x285   : > { %1739 = vmatpush3.bf16.msra.mxu1 %v1738_v26 }
 0x286   : > { %1740 = vmatprep.subr.bf16.mxu1 %v2004_v0 }
 0x288   : > { %v913_v32 = vpop.f32.mrb[6].mxu0 }
 0x289   : > { %v914_v33 = vadd.f32 %v1141_v30, %v913_v32  ;;  %v1527_v34 = vpop.f32.mrb[7].mxu0  ;;  %1742 = vmatpush3.bf16.msra.mxu1 %v1741_v29 }
 0x28a   : > { %1743 = vmatprep.subr.bf16.mxu1 %v2004_v0 }
 0x28b   : > { %v918_v38 = vmul.f32 0.70710677, %v914_v33  ;;  %v917_v47 = vmul.f32 0.5, %v914_v33 }
 0x28d   : > { %1835 = verf.f32 %v918_v38  ;;  %1745 = vmatpush3.bf16.msra.mxu1 %v1744_v35 }
 0x28e   : > { %1746 = vmatprep.subr.bf16.mxu1 %v2004_v0 }
 0x291   : > { %1748 = vmatpush3.bf16.msra.mxu1 %v1747_v39 }
 0x292   : > { %1749 = vmatprep.subr.bf16.mxu1 %v2004_v0 }
 0x295   : > { %1751 = vmatpush3.bf16.msra.mxu1 %v1750_v42 }
 0x296   : > { %1752 = vmatprep.subr.bf16.mxu1 %v2004_v0 }
 0x297   : > { %v1836_v46 = vpop.eup %1835 }
 0x298   : > { %v920_v48 = vadd.f32 1.0, %v1836_v46 }
 0x299   : > { %1754 = vmatpush3.bf16.msra.mxu1 %v1753_v45 }
 0x29a   : > { %v921_v49 = vmul.f32 %v920_v48, %v917_v47 }
 0x29c   : > { %1561 = vmatmul.mubr.f32.vlgmr.msra.gmra.mrb[6].mxu1 %v921_v49 }
 0x34f   : > { %v819_v50 = vpop.f32.mrb[4].mxu1 }
 0x350   : > { %v823_v51 = vadd.f32 %v819_v50, %v2307_v7  ;;  %v1492_v54 = vpop.f32.mrb[5].mxu1 }
 0x36f   : > { %v1004_v52 = vpop.f32.mrb[6].mxu1 }
 0x370   : > { %v1008_v55 = vadd.f32 %v1004_v52, %v823_v51  ;;  %v1562_v0 = vpop.f32.mrb[7].mxu1 }
 0x372   : > { %v1016_v56 = vadd.f32 %v1142_v53, %v1008_v55 }
 0x374   : > { %v1018_v57 = vmul.f32 0.70710677, %v1016_v56  ;;  %v1017_v59 = vmul.f32 0.5, %v1016_v56 }
 0x376   : > { %1837 = verf.f32 %v1018_v57 }
 0x380   : > { %v1838_v58 = vpop.eup %1837 }
 0x381   : > { %v1020_v60 = vadd.f32 1.0, %v1838_v58 }
 0x383   : > { %v1021_v61 = vmul.f32 %v1020_v60, %v1017_v59 }
 0x385   : > { %1022 = vst [vmem:[%s268_s11] sm:$0xff] %v1021_v61 }
 0x386   : > { %1938 = shalt.err (!%p1935_p2)
}
 0x387   : > { %s1939_s14 = scalar_lea.hbm %s2334_s26, 128  ;;  %s1943_s6 = scalar_lea.hbm %s2383_s5, 256 }
 0x388   : > { %p1940_p13 = scmp.ne.s32.totalorder %s2334_s26, %s1939_s14  ;;  %p1944_p4 = scmp.lt.u32.totalorder %s2334_s26, %s2383_s5 }
 0x389   : > { %p1945_p7 = scmp.lt.u32.totalorder %s1943_s6, %s1939_s14  ;;  %p1947_p11 = scmp.lt.u32.totalorder %s1939_s14, %s2334_s26 }
 0x38a   : > { %p1941_p6 = pnand %p1940_p13, %p2397_p0 }
 0x38b   : > { %p1946_p8 = por %p1945_p7, %p1944_p4 }
 0x38c   : > { %p1942_p10 = pneg %p1941_p6 }
 0x38d   : > { %p1948_p1 = por %p1947_p11, %p1946_p8 }
 0x38f   : > { %p1949_p3 = pnand %p1948_p1, %p1942_p10 }
 0x391   : > { %1952 = shalt.err (!%p1949_p3)
}
 0x392   : > { %1765 = dma.vmem_to_hbm [thread:$0]  (%p2397_p0), %s2336_s17, 128, %s2334_s26, %s1024_s10  }
 0x393 PF: > { %s1049_s9 = sand.u32 1, %s1983_s18   ;;  %p2398_p5 = scmp.ne.s32.totalorder %s2388_s25, 0 }
 0x394   : > { %p2399_p9 = scmp.ge.s32.totalorder %s1995_s21, 2  ;;  %s1050_s11 = scalar_lea.sflag [#allocation4], %s1049_s9 }
 0x396   : > { %p1779_p12 = pnand %p2399_p9, %p2398_p5 }
 0x398   : > { %1978 = dma.done.wait (!%p1779_p12), %s1050_s11, 128  }
 0x399   : > { %1980 = vsyncadd (!%p1779_p12), %s1050_s11, 4294967168  ;;  %p19_p2 = scmp.ge.s32.totalorder %s2148_s16, 4   ;;  %s2400_s18 = smov %s1987_s19 }
 0x39a   : > { %s2401_s19 = smov %s1991_s20  ;;  %s2402_s20 = smov %s2157_s27 }
 0x39b   : > { %s2403_s21 = smov %s2148_s16  ;;  %21 = sbr.rel (!%p19_p2) target bundleno = 6 (0x6), region = 93 }
 0x3a2   :  { %1055 = vsyncpa [#allocation3], 1 }
 0x3a3   :  { %1057 = vsyncpa [#allocation3 + $0x1], 1 }
 0x3a4   :  { %1058 = vsyncpa [#allocation6], 1 }
 0x3a5   :  { %1059 = vsyncpa [#allocation4], 1 }
 0x3a6   :  { %1061 = vsyncpa [#allocation4 + $0x1], 1 }

</bundles_post_ra>
